<compile_context>
chip_gen: v7x
topology: tpu7x:2x2x1
jax: 0.10.0
libtpu: 0.0.40
codegen_flags: <defaults>
</compile_context>

<pallas_src>
import jax
import jax.numpy as jnp
import numpy as np
from jax.experimental import pallas as pl
from jax.experimental.pallas import tpu as pltpu


# ----------------------------------------------------------------------------
# Kernel
# ----------------------------------------------------------------------------
def _edla_multi_fused_kernel(x_ref, w0_ref, b0_ref, wlast2_ref, blast_ref, o_ref):
    """Fused forward of all K EDLA networks for one batch tile.

    x_ref      : (bB, D)      input tile (f32; cast in-kernel to weight dtype)
    w0_ref     : (D, K*2H)    folded hidden weights (wp0 + wn0)^T, networks side by side
    b0_ref     : (1, K*2H)    folded hidden biases  (bp0 + bn0), f32
    wlast2_ref : (K*2H, K)    block-diagonal last-layer weights [wp1_k | wn1_k]
    blast_ref  : (1, K)       last-layer biases (bp1 + bn1), f32
    o_ref      : (bB, K)      output tile
    """
    w_dtype = w0_ref.dtype

    # Hidden layer for all K networks in a single MXU matmul (N = K*2H,
    # lane-dense and MXU-width friendly).  f32 accumulation.
    x = x_ref[...].astype(w_dtype)
    pre = jnp.dot(x, w0_ref[...], preferred_element_type=jnp.float32) + b0_ref[...]
    h = jax.nn.sigmoid(pre)                                   # (bB, K*2H), f32 (EUP)

    # Last layer: one MXU matmul against the precomputed block-diagonal
    # Wlast2 -> lands directly in the lane-dense (bB, K) output layout.
    out_pre = jnp.dot(h.astype(wlast2_ref.dtype), wlast2_ref[...],
                      preferred_element_type=jnp.float32) + blast_ref[...]
    o_ref[...] = jax.nn.sigmoid(out_pre).astype(o_ref.dtype)  # sigmoid stays f32


# ----------------------------------------------------------------------------
# One-time parameter folding (hoisted out of the per-call path)
# ----------------------------------------------------------------------------
def fold_edla_multi_params(wp0, bp0, wn0, bn0, wp1, bp1, wn1, bn1,
                           weights_dtype=jnp.float32):
    """Fold raw per-network EDLA parameters into kernel-ready tensors.

    wp0, wn0 : (K, 2H, D)   hidden-layer fc_p / fc_n weights
    bp0, bn0 : (K, 2H)      hidden-layer biases
    wp1, wn1 : (K, 1, H)    last-layer fc_p / fc_n weights
    bp1, bn1 : (K, 1)       last-layer biases
    returns (w0, b0, wlast2, blast):
      w0     : (D, K*2H)  weights_dtype
      b0     : (1, K*2H)  f32
      wlast2 : (K*2H, K)  weights_dtype, block-diagonal
      blast  : (1, K)     f32
    Call this ONCE at parameter-load time; the forward path takes its outputs.
    """
    K, H2, D = wp0.shape
    H = wp1.shape[2]
    # Fold validity: hidden_layers == 1 layout, cat([x,x]) duplication,
    # pre-hidden activation 'None'.
    assert wn0.shape == (K, H2, D) and H2 == 2 * H, (wp0.shape, wp1.shape)
    assert wp1.shape == (K, 1, H) and wn1.shape == (K, 1, H)

    # Hidden layer: both halves of cat([x, x]) are the same x, so fc_p and
    # fc_n fold into one matmul.
    w0 = jnp.transpose(wp0 + wn0, (2, 0, 1)).reshape(D, K * H2)       # (D, K*2H)
    b0 = (bp0 + bn0).reshape(1, K * H2).astype(jnp.float32)           # (1, K*2H)

    # Last layer: per-network weight vector [wp1_k | wn1_k] placed on the
    # block diagonal so the reduction is a single MXU matmul.
    wlast = jnp.concatenate([wp1, wn1], axis=-1).reshape(K, H2)       # (K, 2H)
    eye = jnp.eye(K, dtype=wlast.dtype)
    wlast2 = (wlast[:, :, None] * eye[:, None, :]).reshape(K * H2, K)  # (K*2H, K)
    blast = (bp1 + bn1).reshape(1, K).astype(jnp.float32)             # (1, K)

    return (w0.astype(weights_dtype), b0,
            wlast2.astype(weights_dtype), blast)


# ----------------------------------------------------------------------------
# Forward (hot path) — takes already-folded parameters
# ----------------------------------------------------------------------------
def edla_multi_forward_folded(x, w0, b0, wlast2, blast, *, block_b=256):
    """Pallas forward for EDLA_Multi given folded params.

    x      : (B, D) float32
    returns (B, K) float32
    """
    B, D = x.shape
    KH2, K = wlast2.shape

    # Batch grid: independent B tiles -> "parallel" so Mosaic may shard them
    # across v7x's 2 TensorCores.  For small B this is a single full-extent
    # block (equivalent to a grid-less call).  Weight blocks keep block index
    # (0, 0) for every grid step, so they stay resident in VMEM (no re-DMA).
    bb = min(B, block_b)
    grid = (pl.cdiv(B, bb),)

    return pl.pallas_call(
        _edla_multi_fused_kernel,
        out_shape=jax.ShapeDtypeStruct((B, K), jnp.float32),
        grid=grid,
        in_specs=[
            pl.BlockSpec((bb, D), lambda i: (i, 0)),        # x tile
            pl.BlockSpec((D, KH2), lambda i: (0, 0)),       # w0 (resident)
            pl.BlockSpec((1, KH2), lambda i: (0, 0)),       # b0 (resident)
            pl.BlockSpec((KH2, K), lambda i: (0, 0)),       # wlast2 (resident)
            pl.BlockSpec((1, K), lambda i: (0, 0)),         # blast (resident)
        ],
        out_specs=pl.BlockSpec((bb, K), lambda i: (i, 0)),  # lane-dense (B, K)
        compiler_params=pltpu.CompilerParams(
            dimension_semantics=("parallel",),
            # Safe on v7x (64 MiB physical VMEM) as well as v5e/v6e (128 MiB).
            # TODO(synk): if D or K*2H grow into the MiB range, add an
            # 'arbitrary' D-reduction axis + f32 VMEM accumulator and size
            # blocks against 64 MiB (v7x) with double-buffering headroom.
            vmem_limit_bytes=32 * 1024 * 1024),
    )(x, w0, b0, wlast2, blast)


def edla_multi_forward(x, wp0, bp0, wn0, bn0, wp1, bp1, wn1, bn1,
                       weights_dtype=jnp.float32):
    """Convenience wrapper: fold + forward.  For hot loops, call
    fold_edla_multi_params once and edla_multi_forward_folded per step."""
    folded = fold_edla_multi_params(wp0, bp0, wn0, bn0, wp1, bp1, wn1, bn1,
                                    weights_dtype=weights_dtype)
    return edla_multi_forward_folded(x, *folded)


# ----------------------------------------------------------------------------
# Pure-JAX reference mirroring the PyTorch module literally
# ----------------------------------------------------------------------------
def edla_multi_reference(x, wp0, bp0, wn0, bn0, wp1, bp1, wn1, bn1):
    B, D = x.shape
    K = wp0.shape[0]
    H = wp1.shape[2]
    x_cat = jnp.concatenate([x, x], axis=1)                  # torch.cat([x, x], dim=1)
    outs = []
    for k in range(K):
        # activation_fns[0] == 'None'
        h_pre = (x_cat[:, :D] @ wp0[k].T + bp0[k]
                 + x_cat[:, D:] @ wn0[k].T + bn0[k])
        h = jax.nn.sigmoid(h_pre)                            # hidden 'Sigmoid'
        pre = (h[:, :H] @ wp1[k, 0] + bp1[k, 0]
               + h[:, H:] @ wn1[k, 0] + bn1[k, 0])
        outs.append(jax.nn.sigmoid(pre))                     # last 'Sigmoid'
    return jnp.stack(outs, axis=1)                           # (B, K)


if __name__ == "__main__":
    # Small deterministic shapes: batch=8, input_size=16, hidden_size=32,
    # output_size (== number of bundled EDLA nets) = 4, hidden_layers=1.
    B, D, H, K = 8, 16, 32, 4
    H2 = 2 * H

    key = jax.random.PRNGKey(0)
    ks = jax.random.split(key, 9)

    # Deterministic parameter init mimicking EDLayer.initialize_weights:
    #  fc_p ~ U(-1, 0) with the first `output_size` rows sign-flipped (positive),
    #  fc_n ~ U(0, 1)  with the first `output_size` rows sign-flipped (negative).
    sign_hidden = jnp.concatenate([-jnp.ones(H), jnp.ones(H)])   # first H rows flipped

    wp0 = jax.random.uniform(ks[0], (K, H2, D), minval=-1.0, maxval=0.0) * sign_hidden[None, :, None]
    bp0 = jax.random.uniform(ks[1], (K, H2), minval=-1.0, maxval=0.0) * sign_hidden[None, :]
    wn0 = jax.random.uniform(ks[2], (K, H2, D), minval=0.0, maxval=1.0) * sign_hidden[None, :, None]
    bn0 = jax.random.uniform(ks[3], (K, H2), minval=0.0, maxval=1.0) * sign_hidden[None, :]

    wp1 = jax.random.uniform(ks[4], (K, 1, H), minval=-1.0, maxval=0.0) * -1.0
    bp1 = jax.random.uniform(ks[5], (K, 1), minval=-1.0, maxval=0.0) * -1.0
    wn1 = jax.random.uniform(ks[6], (K, 1, H), minval=0.0, maxval=1.0) * -1.0
    bn1 = jax.random.uniform(ks[7], (K, 1), minval=0.0, maxval=1.0) * -1.0

    x = jax.random.normal(ks[8], (B, D), dtype=jnp.float32)

    ref = edla_multi_reference(x, wp0, bp0, wn0, bn0, wp1, bp1, wn1, bn1)

    # --- fold parameters ONCE (hoisted out of the per-call path) -------------
    folded_f32 = jax.block_until_ready(
        fold_edla_multi_params(wp0, bp0, wn0, bn0, wp1, bp1, wn1, bn1,
                               weights_dtype=jnp.float32))
    folded_bf16 = jax.block_until_ready(
        fold_edla_multi_params(wp0, bp0, wn0, bn0, wp1, bp1, wn1, bn1,
                               weights_dtype=jnp.bfloat16))

    fwd = jax.jit(edla_multi_forward_folded)

    # f32 path.
    out_f32 = jax.block_until_ready(fwd(x, *folded_f32))
    assert out_f32.shape == (B, K), out_f32.shape
    np.testing.assert_allclose(np.asarray(out_f32), np.asarray(ref),
                               rtol=1e-5, atol=1e-5)

    # bf16-weights path (both MXU matmuls bf16, f32 accumulation + f32
    # sigmoids), at a correspondingly looser tolerance.
    out_bf16 = jax.block_until_ready(fwd(x, *folded_bf16))
    np.testing.assert_allclose(np.asarray(out_bf16), np.asarray(ref),
                               rtol=2e-2, atol=2e-2)

    # TODO(synk): EDLA.update / update_core (the error-diffusion training rule)
    # is not part of the forward pass and is not implemented here.
    print("KERNEL_OK")
</pallas_src>

<mosaic_0001>
module attributes {stable_mosaic.version = 11 : i64} {
  func.func @_edla_multi_fused_kernel(%arg0: i32, %arg1: memref<8x16xf32, #tpu.memory_space<vmem>>, %arg2: memref<16x256xf32, #tpu.memory_space<vmem>>, %arg3: memref<1x256xf32, #tpu.memory_space<vmem>>, %arg4: memref<256x4xf32, #tpu.memory_space<vmem>>, %arg5: memref<1x4xf32, #tpu.memory_space<vmem>>, %arg6: memref<8x4xf32, #tpu.memory_space<vmem>>) attributes {dimension_semantics = [#tpu.dimension_semantics<parallel>], iteration_bounds = array<i64: 1>, scalar_prefetch = 0 : i64, scratch_operands = 0 : i64, tpu.core_type = #tpu.core_type<tc>, window_params = [{transform_indices = @transform_0, window_bounds = array<i64: 8, 16>}, {pipeline_mode = #tpu.pipeline_mode<synchronous>, transform_indices = @transform_1, window_bounds = array<i64: 16, 256>}, {pipeline_mode = #tpu.pipeline_mode<synchronous>, transform_indices = @transform_2, window_bounds = array<i64: 1, 256>}, {pipeline_mode = #tpu.pipeline_mode<synchronous>, transform_indices = @transform_3, window_bounds = array<i64: 256, 4>}, {pipeline_mode = #tpu.pipeline_mode<synchronous>, transform_indices = @transform_4, window_bounds = array<i64: 1, 4>}, {transform_indices = @transform_5, window_bounds = array<i64: 8, 4>}]} {
    %c0 = arith.constant 0 : index
    %c0_0 = arith.constant 0 : index
    %0 = vector.load %arg1[%c0, %c0_0] : memref<8x16xf32, #tpu.memory_space<vmem>>, vector<8x16xf32>
    %c0_1 = arith.constant 0 : index
    %c0_2 = arith.constant 0 : index
    %1 = vector.load %arg2[%c0_1, %c0_2] : memref<16x256xf32, #tpu.memory_space<vmem>>, vector<16x256xf32>
    %cst = arith.constant dense<0.000000e+00> : vector<8x256xf32>
    %2 = tpu.matmul %0, %1, %cst {dimension_numbers = #tpu.dot_dimension_numbers<[1], [0], [0], [1], [0, 0, 1, 1], [], []>} : vector<8x16xf32>, vector<16x256xf32>, vector<8x256xf32> -> vector<8x256xf32>
    %c0_3 = arith.constant 0 : index
    %c0_4 = arith.constant 0 : index
    %3 = vector.load %arg3[%c0_3, %c0_4] : memref<1x256xf32, #tpu.memory_space<vmem>>, vector<1x256xf32>
    %4 = vector.broadcast %3 : vector<1x256xf32> to vector<8x256xf32>
    %5 = arith.addf %2, %4 : vector<8x256xf32>
    %6 = arith.negf %5 : vector<8x256xf32>
    %7 = math.exp %6 : vector<8x256xf32>
    %cst_5 = arith.constant 1.000000e+00 : f32
    %8 = vector.broadcast %cst_5 : f32 to vector<8x256xf32>
    %9 = arith.addf %8, %7 : vector<8x256xf32>
    %10 = arith.divf %8, %9 : vector<8x256xf32>
    %c0_6 = arith.constant 0 : index
    %c0_7 = arith.constant 0 : index
    %11 = vector.load %arg4[%c0_6, %c0_7] : memref<256x4xf32, #tpu.memory_space<vmem>>, vector<256x4xf32>
    %cst_8 = arith.constant dense<0.000000e+00> : vector<8x4xf32>
    %12 = tpu.matmul %10, %11, %cst_8 {dimension_numbers = #tpu.dot_dimension_numbers<[1], [0], [0], [1], [0, 0, 1, 1], [], []>} : vector<8x256xf32>, vector<256x4xf32>, vector<8x4xf32> -> vector<8x4xf32>
    %c0_9 = arith.constant 0 : index
    %c0_10 = arith.constant 0 : index
    %13 = vector.load %arg5[%c0_9, %c0_10] : memref<1x4xf32, #tpu.memory_space<vmem>>, vector<1x4xf32>
    %14 = vector.broadcast %13 : vector<1x4xf32> to vector<8x4xf32>
    %15 = arith.addf %12, %14 : vector<8x4xf32>
    %16 = arith.negf %15 : vector<8x4xf32>
    %17 = math.exp %16 : vector<8x4xf32>
    %cst_11 = arith.constant 1.000000e+00 : f32
    %18 = vector.broadcast %cst_11 : f32 to vector<8x4xf32>
    %19 = arith.addf %18, %17 : vector<8x4xf32>
    %20 = arith.divf %18, %19 : vector<8x4xf32>
    %c0_12 = arith.constant 0 : index
    %c0_13 = arith.constant 0 : index
    %21 = vector.load %arg6[%c0_12, %c0_13] : memref<8x4xf32, #tpu.memory_space<vmem>>, vector<8x4xf32>
    tpu.vector_store %arg6[%c0_12, %c0_13], %20 {strides = array<i32>} : memref<8x4xf32, #tpu.memory_space<vmem>>, vector<8x4xf32>,
    return
  }
  func.func @transform_0(%arg0: i32) -> (i32, i32) {
    %c0_i32 = arith.constant 0 : i32
    %c0_i32_0 = arith.constant 0 : i32
    return %arg0, %c0_i32 : i32, i32
  }
  func.func @transform_1(%arg0: i32) -> (i32, i32) {
    %c0_i32 = arith.constant 0 : i32
    %c0_i32_0 = arith.constant 0 : i32
    %c0_i32_1 = arith.constant 0 : i32
    return %c0_i32, %c0_i32_0 : i32, i32
  }
  func.func @transform_2(%arg0: i32) -> (i32, i32) {
    %c0_i32 = arith.constant 0 : i32
    %c0_i32_0 = arith.constant 0 : i32
    %c0_i32_1 = arith.constant 0 : i32
    return %c0_i32, %c0_i32_0 : i32, i32
  }
  func.func @transform_3(%arg0: i32) -> (i32, i32) {
    %c0_i32 = arith.constant 0 : i32
    %c0_i32_0 = arith.constant 0 : i32
    %c0_i32_1 = arith.constant 0 : i32
    return %c0_i32, %c0_i32_0 : i32, i32
  }
  func.func @transform_4(%arg0: i32) -> (i32, i32) {
    %c0_i32 = arith.constant 0 : i32
    %c0_i32_0 = arith.constant 0 : i32
    %c0_i32_1 = arith.constant 0 : i32
    return %c0_i32, %c0_i32_0 : i32, i32
  }
  func.func @transform_5(%arg0: i32) -> (i32, i32) {
    %c0_i32 = arith.constant 0 : i32
    %c0_i32_0 = arith.constant 0 : i32
    return %arg0, %c0_i32 : i32, i32
  }
}

</mosaic_0001>

<bundles_post_ra>
// kernel: edla_multi_forward_folded.1
= control target key start
LH: loop header
LB: loop body
LE: loop exit
PB: predicated region body
PF: predicated region fallthrough
CT: control target
= control target key end

     0   :  { %v334_v3 = vmov 0.0   ;;  %vm37_vm0 = vcmask 130048   ;;  %v27_v56 = vlaneseq  ;;  %vm239_vm1 = vcmask 31744   ;;  %s485_s1 = inlined_call_operand.vmem [shape: f32[16,256], index: 1, kind: input, shape index: {}]   ;;  %s486_s3 = inlined_call_operand.vmem [shape: f32[256,4], index: 3, kind: input, shape index: {}]   ;;  %s487_s0 = inlined_call_operand.vmem [shape: f32[8,16], index: 0, kind: input, shape index: {}]   ;;  %s488_s2 = inlined_call_operand.vmem [shape: f32[1,256], index: 2, kind: input, shape index: {}]   ;;  %s489_s4 = inlined_call_operand.vmem [shape: f32[1,4], index: 4, kind: input, shape index: {}]   ;;  %s490_s5 = inlined_call_operand.vmem [shape: f32[8,4], index: 5, kind: output, shape index: {}]  }
   0x1   :  { %v22_v0 = vld [vmem:[%s485_s1 + $0x8] sm:$0xff]  ;;  %v24_v1 = vld [vmem:[%s485_s1 + $0x18] sm:$0xff]  ;;  %v21_v2 = vld [vmem:[%s485_s1] sm:$0xff]  ;;  %105 = vmatprep.mubr.f32.mxu0 %v334_v3 }
   0x2   :  { %v285_v4 = vpack.c.bf16 %v24_v1, %v22_v0  ;;  %v23_v5 = vld [vmem:[%s485_s1 + $0x10] sm:$0xff]  ;;  %v140_v6 = vld [vmem:[%s486_s3 + $0x80] sm:$0xff]  ;;  %v141_v8 = vld [vmem:[%s486_s3 + $0x88] sm:$0xff]  ;;  %v28_v57 = vshrl.u32 %v27_v56, 7 }
   0x3   :  { %v287_v7 = vpack.c.bf16 %v23_v5, %v21_v2  ;;  %v289_v9 = vpack.c.bf16 %v141_v8, %v140_v6  ;;  %v20_v10 = vld [vmem:[%s487_s0] sm:$0xff]  ;;  %v125_v12 = vld [vmem:[%s486_s3 + $0x8] sm:$0xff]  ;;  %v142_v14 = vld [vmem:[%s486_s3 + $0x90] sm:$0xff] }
   0x4   :  { %286 = vmatprep.subr.bf16.mxu0 %v285_v4  ;;  %v124_v11 = vld [vmem:[%s486_s3] sm:$0xff]  ;;  %v143_v15 = vld [vmem:[%s486_s3 + $0x98] sm:$0xff]  ;;  %v126_v17 = vld [vmem:[%s486_s3 + $0x10] sm:$0xff]  ;;  %v29_v58 = vsub.s32 0, %v28_v57  ;;  %v33_v60 = vsub.s32 1, %v28_v57 }
   0x5   :  { %288 = vmatpush1.bf16.msra.mxu0 %v287_v7  ;;  %290 = vmatprep.subr.bf16.mxu1 %v289_v9  ;;  %v291_v13 = vpack.c.bf16 %v125_v12, %v124_v11  ;;  %v293_v16 = vpack.c.bf16 %v143_v15, %v142_v14  ;;  %v127_v18 = vld [vmem:[%s486_s3 + $0x18] sm:$0xff]  ;;  %v144_v20 = vld [vmem:[%s486_s3 + $0xa0] sm:$0xff]  ;;  %v145_v21 = vld [vmem:[%s486_s3 + $0xa8] sm:$0xff] }
   0x6   :  { %v295_v19 = vpack.c.bf16 %v127_v18, %v126_v17  ;;  %v297_v22 = vpack.c.bf16 %v145_v21, %v144_v20  ;;  %v128_v23 = vld [vmem:[%s486_s3 + $0x20] sm:$0xff]  ;;  %v129_v24 = vld [vmem:[%s486_s3 + $0x28] sm:$0xff]  ;;  %v146_v26 = vld [vmem:[%s486_s3 + $0xb0] sm:$0xff] }
   0x7   :  { %292 = vmatpush3.bf16.msra.mxu1 %v291_v13  ;;  %v299_v25 = vpack.c.bf16 %v129_v24, %v128_v23  ;;  %v147_v27 = vld [vmem:[%s486_s3 + $0xb8] sm:$0xff]  ;;  %v130_v29 = vld [vmem:[%s486_s3 + $0x30] sm:$0xff]  ;;  %v148_v32 = vld [vmem:[%s486_s3 + $0xc0] sm:$0xff] }
   0x8   :  { %245 = vmatmul.mubr.msk.f32.vlgmr.msra.gmra.mrb[0].mxu0 %vm37_vm0, %v20_v10  ;;  %294 = vmatprep.subr.bf16.mxu1 %v293_v16  ;;  %v301_v28 = vpack.c.bf16 %v147_v27, %v146_v26  ;;  %v131_v30 = vld [vmem:[%s486_s3 + $0x38] sm:$0xff]  ;;  %v149_v33 = vld [vmem:[%s486_s3 + $0xc8] sm:$0xff]  ;;  %v132_v35 = vld [vmem:[%s486_s3 + $0x40] sm:$0xff] }
   0x9   :  { %v303_v31 = vpack.c.bf16 %v131_v30, %v130_v29  ;;  %v305_v34 = vpack.c.bf16 %v149_v33, %v148_v32  ;;  %v133_v36 = vld [vmem:[%s486_s3 + $0x48] sm:$0xff]  ;;  %v150_v38 = vld [vmem:[%s486_s3 + $0xd0] sm:$0xff]  ;;  %v151_v39 = vld [vmem:[%s486_s3 + $0xd8] sm:$0xff] }
   0xa   :  { %v307_v37 = vpack.c.bf16 %v133_v36, %v132_v35  ;;  %v309_v40 = vpack.c.bf16 %v151_v39, %v150_v38  ;;  %v134_v41 = vld [vmem:[%s486_s3 + $0x50] sm:$0xff]  ;;  %v135_v42 = vld [vmem:[%s486_s3 + $0x58] sm:$0xff]  ;;  %v152_v44 = vld [vmem:[%s486_s3 + $0xe0] sm:$0xff] }
   0xb   :  { %296 = vmatpush3.bf16.msra.mxu1 %v295_v19  ;;  %v311_v43 = vpack.c.bf16 %v135_v42, %v134_v41  ;;  %v153_v45 = vld [vmem:[%s486_s3 + $0xe8] sm:$0xff]  ;;  %v136_v46 = vld [vmem:[%s486_s3 + $0x60] sm:$0xff]  ;;  %v154_v49 = vld [vmem:[%s486_s3 + $0xf0] sm:$0xff] }
   0xc   :  { %298 = vmatprep.subr.bf16.mxu1 %v297_v22  ;;  %v313_v47 = vpack.c.bf16 %v153_v45, %v152_v44  ;;  %v137_v48 = vld [vmem:[%s486_s3 + $0x68] sm:$0xff]  ;;  %v155_v50 = vld [vmem:[%s486_s3 + $0xf8] sm:$0xff]  ;;  %v138_v53 = vld [vmem:[%s486_s3 + $0x70] sm:$0xff] }
   0xd   :  { %v315_v51 = vpack.c.bf16 %v137_v48, %v136_v46  ;;  %v317_v52 = vpack.c.bf16 %v155_v50, %v154_v49  ;;  %v139_v54 = vld [vmem:[%s486_s3 + $0x78] sm:$0xff]  ;;  %v25_v59 = vld [vmem:[%s488_s2] sm:$0x3] }
   0xe   :  { %v319_v55 = vpack.c.bf16 %v139_v54, %v138_v53  ;;  %v30_v61 = vrot.slane %v25_v59, %v29_v58  ;;  %v34_v62 = vrot.slane %v25_v59, %v33_v60  ;;  %v248_v12 = vld [vmem:[%s489_s4] ss:$0 sm:$0xff] }
   0xf   :  { %300 = vmatpush3.bf16.msra.mxu1 %v299_v25 }
  0x10   :  { %302 = vmatprep.subr.bf16.mxu1 %v301_v28 }
  0x13   :  { %304 = vmatpush3.bf16.msra.mxu1 %v303_v31 }
  0x14   :  { %306 = vmatprep.subr.bf16.mxu1 %v305_v34 }
  0x17   :  { %308 = vmatpush3.bf16.msra.mxu1 %v307_v37 }
  0x18   :  { %310 = vmatprep.subr.bf16.mxu1 %v309_v40 }
  0x1b   :  { %312 = vmatpush3.bf16.msra.mxu1 %v311_v43 }
  0x1c   :  { %314 = vmatprep.subr.bf16.mxu1 %v313_v47 }
  0x1f   :  { %316 = vmatpush3.bf16.msra.mxu1 %v315_v51 }
  0x20   :  { %318 = vmatprep.subr.bf16.mxu1 %v317_v52 }
  0x23   :  { %320 = vmatpush3.bf16.msra.mxu1 %v319_v55 }
  0xdb   :  { %v107_v63 = vpop.f32.mrb[0].mxu0 }
  0xdc   :  { %v108_v0 = vadd.f32 %v107_v63, %v30_v61  ;;  %v109_v1 = vpop.f32.mrb[1].mxu0 }
  0xdd   :  { %v110_v2 = vadd.f32 %v109_v1, %v34_v62 }
  0xde   :  { %v246_v3 = vmul.f32 -1.442695, %v108_v0 }
  0xdf   :  { %v247_v4 = vmul.f32 -1.442695, %v110_v2 }
  0xe0   :  { %322 = vpow2.f32 %v246_v3 }
  0xe1   :  { %324 = vpow2.f32 %v247_v4 }
  0xea   :  { %v323_v5 = vpop.eup %322 }
  0xeb   :  { %v325_v6 = vpop.eup %324  ;;  %v118_v7 = vadd.f32 1.0, %v323_v5 }
  0xec   :  { %v119_v8 = vadd.f32 1.0, %v325_v6 }
  0xee   :  { %326 = vrcp.f32 %v119_v8 }
  0xef   :  { %328 = vrcp.f32 %v118_v7 }
  0xf8   :  { %v327_v9 = vpop.eup %326 }
  0xf9   :  { %v329_v10 = vpop.eup %328  ;;  %227 = vmatprep.mubr.f32.mxu1 %v327_v9 }
  0xfa   :  { %228 = vmatmul.mubr.f32.vlgmr.msra.gmra.mrb[0].mxu1 %v329_v10 }
 0x1cd   :  { %v282_v11 = vpop.f32.mrb[0].mxu1 }
 0x1ce   :  { %v283_v13 = vpop.f32.mrb[1].mxu1 }
 0x1cf   :  { %v284_v14 = vadd.f32 %v283_v13, %v282_v11 }
 0x1d1   :  { %v230_v15 = vadd.f32 %v284_v14, %v248_v12 }
 0x1d3   :  { %v249_v16 = vmul.f32 -1.442695, %v230_v15 }
 0x1d5   :  { %330 = vpow2.f32 %v249_v16 }
 0x1df   :  { %v331_v17 = vpop.eup %330 }
 0x1e0   :  { %v236_v18 = vadd.f32 1.0, %v331_v17 }
 0x1e2   :  { %332 = vrcp.f32 %v236_v18 }
 0x1ec   :  { %v333_v19 = vpop.eup %332 }
 0x1ed   :  { %240 = vst.msk [vmem:[%s490_s5] sm:$0xff] %vm239_vm1, %v333_v19 }

</bundles_post_ra>
